<compile_context>
chip_gen: v5e
topology: v5e:2x2
jax: 0.10.0
libtpu: 0.0.40
codegen_flags: <defaults>
</compile_context>

<pallas_src>
import functools

import jax
import jax.numpy as jnp
from jax.experimental import pallas as pl
from jax.experimental.pallas import tpu as pltpu


def _round_up(v, m):
    return ((v + m - 1) // m) * m


# --------------------------------------------------------------------------
# Kernels
# --------------------------------------------------------------------------
def _linear_kernel(x_ref, wt_ref, b_ref, o_ref):
    # y = x @ Wt + b ; Wt is pre-transposed to (D, O_pad) in the wrapper.
    y = jnp.dot(x_ref[...], wt_ref[...], preferred_element_type=jnp.float32)
    o_ref[...] = (y + b_ref[...]).astype(o_ref.dtype)


def _t3a_kernel(x_ref, wdt_ref, bd_ref, supt_ref, o_ref, *, num_domain, c_pad):
    x = x_ref[...]                                            # (bn, D) bf16

    # domain_classifier(x) -> softmax over domains (f32 math).
    dlog = jnp.dot(x, wdt_ref[...], preferred_element_type=jnp.float32)
    dlog = dlog + bd_ref[...]                                 # (bn, Dm)
    dlog = dlog - jnp.max(dlog, axis=1, keepdims=True)
    dexp = jnp.exp(dlog)
    dprob = dexp * pl.reciprocal(jnp.sum(dexp, axis=1, keepdims=True),
                                 approx=True)                 # (bn, Dm)

    # One fused MXU matmul over ALL domains: (bn, D) @ (D, Dm*C_pad).
    logits = jnp.dot(x, supt_ref[...],
                     preferred_element_type=jnp.float32)      # (bn, Dm*C_pad)

    # dprob weighting: small static VPU loop over 128-aligned lane slices.
    acc = jnp.zeros(o_ref.shape, jnp.float32)                 # (bn, C_pad)
    for d in range(num_domain):
        acc = acc + logits[:, d * c_pad:(d + 1) * c_pad] * dprob[:, d:d + 1]
    o_ref[...] = acc.astype(o_ref.dtype)


# --------------------------------------------------------------------------
# Wrappers
# --------------------------------------------------------------------------
_VMEM_LIMIT = 48 * 1024 * 1024  # headroom under v7x's 64 MiB physical VMEM


def linear_pallas(x, w, b, *, block_n=256):
    """nn.Linear: x [N, D], w [O, D], b [O] -> [N, O] (bf16 matmul, f32 accum)."""
    N, D = x.shape
    O = w.shape[0]
    O_pad = _round_up(O, 128)

    wt = jnp.pad(jnp.transpose(w), ((0, 0), (0, O_pad - O))).astype(jnp.bfloat16)
    bp = jnp.pad(b, (0, O_pad - O)).reshape(1, O_pad).astype(jnp.float32)

    bn = min(block_n, _round_up(N, 8))
    N_pad = _round_up(N, bn)
    x_p = jnp.pad(x, ((0, N_pad - N), (0, 0))).astype(jnp.bfloat16)

    out = pl.pallas_call(
        _linear_kernel,
        out_shape=jax.ShapeDtypeStruct((N_pad, O_pad), jnp.float32),
        grid=(N_pad // bn,),
        in_specs=[
            pl.BlockSpec((bn, D), lambda i: (i, 0)),        # x: tiled over N
            pl.BlockSpec((D, O_pad), lambda i: (0, 0)),     # W^T: resident
            pl.BlockSpec((1, O_pad), lambda i: (0, 0)),     # bias: resident
        ],
        out_specs=pl.BlockSpec((bn, O_pad), lambda i: (i, 0)),
        compiler_params=pltpu.CompilerParams(
            dimension_semantics=("parallel",),
            vmem_limit_bytes=_VMEM_LIMIT),
        cost_estimate=pl.CostEstimate(
            flops=2 * N_pad * D * O_pad,
            transcendentals=0,
            bytes_accessed=(N_pad * D * 2 + D * O_pad * 2
                            + O_pad * 4 + N_pad * O_pad * 4)),
    )(x_p, wt, bp)
    return out[:N, :O]


def t3a_pallas(x, w_dom, b_dom, supports, *, block_n=256):
    """T3A prediction path: x [N, D], supports [Dm, C, D] -> [N, C]."""
    N, D = x.shape
    Dm, C, _ = supports.shape
    C_pad = _round_up(C, 128)

    # Pad the class dim to a lane-dense multiple of 128, flatten to 2-D and
    # pre-transpose to (D, Dm*C_pad) so the kernel does a single clean matmul.
    sup_p = jnp.pad(supports, ((0, 0), (0, C_pad - C), (0, 0)))
    sup_t = jnp.transpose(sup_p.reshape(Dm * C_pad, D)).astype(jnp.bfloat16)
    wdt = jnp.transpose(w_dom).astype(jnp.bfloat16)           # (D, Dm)
    bd = b_dom.reshape(1, Dm).astype(jnp.float32)

    bn = min(block_n, _round_up(N, 8))
    N_pad = _round_up(N, bn)
    x_p = jnp.pad(x, ((0, N_pad - N), (0, 0))).astype(jnp.bfloat16)

    kernel = functools.partial(_t3a_kernel, num_domain=Dm, c_pad=C_pad)
    out = pl.pallas_call(
        kernel,
        out_shape=jax.ShapeDtypeStruct((N_pad, C_pad), jnp.float32),
        grid=(N_pad // bn,),
        in_specs=[
            pl.BlockSpec((bn, D), lambda i: (i, 0)),            # x: tiled over N
            pl.BlockSpec((D, Dm), lambda i: (0, 0)),            # domain W^T: resident
            pl.BlockSpec((1, Dm), lambda i: (0, 0)),            # domain bias: resident
            pl.BlockSpec((D, Dm * C_pad), lambda i: (0, 0)),    # supports^T: resident
        ],
        out_specs=pl.BlockSpec((bn, C_pad), lambda i: (i, 0)),
        compiler_params=pltpu.CompilerParams(
            dimension_semantics=("parallel",),
            vmem_limit_bytes=_VMEM_LIMIT),
        cost_estimate=pl.CostEstimate(
            flops=2 * N_pad * D * (Dm * C_pad + Dm) + 2 * N_pad * Dm * C_pad,
            transcendentals=N_pad * Dm,
            bytes_accessed=(N_pad * D * 2 + D * Dm * C_pad * 2 + D * Dm * 2
                            + Dm * 4 + N_pad * C_pad * 4)),
    )(x_p, wdt, bd, sup_t)
    return out[:N, :C]


class T3AJax:
    """Parameter container mirroring T3A (inference paths, adapt=False)."""

    def __init__(self, key, in_dim, num_classes, num_domain, bias=False):
        k1, k2, k3, k4, k5 = jax.random.split(key, 5)
        s = 1.0 / jnp.sqrt(in_dim)
        # last_layer: nn.Linear(in_dim, num_classes)
        self.w_last = jax.random.uniform(k1, (num_classes, in_dim), jnp.float32, -s, s)
        self.b_last = jax.random.uniform(k2, (num_classes,), jnp.float32, -s, s)
        # domain_classifier: nn.Linear(in_dim, num_domain)
        self.w_dom = jax.random.uniform(k3, (num_domain, in_dim), jnp.float32, -s, s)
        self.b_dom = jax.random.uniform(k4, (num_domain,), jnp.float32, -s, s)
        # geted_supports: (num_domain, num_classes, in_dim) class prototypes
        self.geted_supports = jax.random.normal(
            k5, (num_domain, num_classes, in_dim), jnp.float32) * 0.1
        self.bias = bias  # default False -> last_layer.bias not added in T3A path

    @staticmethod
    def _flatten_features(x):
        # torch does x.squeeze(); only flatten the non-batch singleton dims so a
        # batch of size 1 keeps its leading axis.
        return x.reshape(x.shape[0], -1) if x.ndim > 2 else x

    def forward(self, x, use_T3A=False, training=False):
        x = self._flatten_features(x)
        if not use_T3A and training:
            return (linear_pallas(x, self.w_last, self.b_last),
                    linear_pallas(x, self.w_dom, self.b_dom))
        if not use_T3A and not training:
            return linear_pallas(x, self.w_last, self.b_last)
        out = t3a_pallas(x, self.w_dom, self.b_dom, self.geted_supports)
        if self.bias:
            # torch adds bias pre-bmm; equivalent post-weighting since the
            # domain probabilities sum to 1.
            out = out + self.b_last
        return out

    # plain-JAX f32 reference for validation
    def reference_t3a(self, x):
        x = self._flatten_features(x)
        dlog = x @ self.w_dom.T + self.b_dom
        dprob = jax.nn.softmax(dlog, axis=1)                        # (N, Dm)
        per_dom = jnp.einsum("nd,kcd->knc", x, self.geted_supports)  # (Dm, N, C)
        return jnp.einsum("knc,nk->nc", per_dom, dprob)


# --------------------------------------------------------------------------
if __name__ == "__main__":
    N, D, C, DM = 8, 128, 16, 6  # batch, in_dim, num_classes, num_domain

    key = jax.random.PRNGKey(0)
    kp, kx = jax.random.split(key)
    model = T3AJax(kp, in_dim=D, num_classes=C, num_domain=DM, bias=False)

    x = jax.random.normal(kx, (N, 1, D), jnp.float32)  # flattened to (N, D)

    # eval path (use_T3A=False, not training)
    y_eval = model.forward(x, use_T3A=False, training=False)
    jax.block_until_ready(y_eval)
    ref_eval = x.reshape(N, D) @ model.w_last.T + model.b_last
    assert y_eval.shape == (N, C)
    # bf16 matmul operands -> loosened tolerance vs the f32 reference
    assert jnp.allclose(y_eval, ref_eval, atol=5e-2, rtol=5e-2)

    # training path (returns (last_layer(x), domain_classifier(x)))
    y_cls, y_dom = model.forward(x, use_T3A=False, training=True)
    jax.block_until_ready((y_cls, y_dom))
    assert y_cls.shape == (N, C) and y_dom.shape == (N, DM)

    # T3A path
    y_t3a = model.forward(x, use_T3A=True)
    jax.block_until_ready(y_t3a)
    ref_t3a = model.reference_t3a(x)
    assert y_t3a.shape == (N, C)
    assert jnp.allclose(y_t3a, ref_t3a, atol=5e-2, rtol=5e-2)

    print("KERNEL_OK")
</pallas_src>

<mosaic_0001>
module attributes {stable_mosaic.version = 11 : i64} {
  func.func @_linear_kernel(%arg0: i32, %arg1: memref<8x128xbf16, #tpu.memory_space<vmem>>, %arg2: memref<128x128xbf16, #tpu.memory_space<vmem>>, %arg3: memref<1x128xf32, #tpu.memory_space<vmem>>, %arg4: memref<8x128xf32, #tpu.memory_space<vmem>>) attributes {dimension_semantics = [#tpu.dimension_semantics<parallel>], iteration_bounds = array<i64: 1>, scalar_prefetch = 0 : i64, scratch_operands = 0 : i64, tpu.core_type = #tpu.core_type<tc>, window_params = [{transform_indices = @transform_0, window_bounds = array<i64: 8, 128>}, {pipeline_mode = #tpu.pipeline_mode<synchronous>, transform_indices = @transform_1, window_bounds = array<i64: 128, 128>}, {pipeline_mode = #tpu.pipeline_mode<synchronous>, transform_indices = @transform_2, window_bounds = array<i64: 1, 128>}, {transform_indices = @transform_3, window_bounds = array<i64: 8, 128>}]} {
    %c0 = arith.constant 0 : index
    %c0_0 = arith.constant 0 : index
    %0 = vector.load %arg1[%c0, %c0_0] : memref<8x128xbf16, #tpu.memory_space<vmem>>, vector<8x128xbf16>
    %c0_1 = arith.constant 0 : index
    %c0_2 = arith.constant 0 : index
    %1 = vector.load %arg2[%c0_1, %c0_2] : memref<128x128xbf16, #tpu.memory_space<vmem>>, vector<128x128xbf16>
    %cst = arith.constant dense<0.000000e+00> : vector<8x128xf32>
    %2 = tpu.matmul %0, %1, %cst {dimension_numbers = #tpu.dot_dimension_numbers<[1], [0], [0], [1], [0, 0, 1, 1], [], []>} : vector<8x128xbf16>, vector<128x128xbf16>, vector<8x128xf32> -> vector<8x128xf32>
    %c0_3 = arith.constant 0 : index
    %c0_4 = arith.constant 0 : index
    %3 = vector.load %arg3[%c0_3, %c0_4] : memref<1x128xf32, #tpu.memory_space<vmem>>, vector<1x128xf32>
    %4 = vector.broadcast %3 : vector<1x128xf32> to vector<8x128xf32>
    %5 = arith.addf %2, %4 : vector<8x128xf32>
    %c0_5 = arith.constant 0 : index
    %c0_6 = arith.constant 0 : index
    %6 = vector.load %arg4[%c0_5, %c0_6] : memref<8x128xf32, #tpu.memory_space<vmem>>, vector<8x128xf32>
    tpu.vector_store %arg4[%c0_5, %c0_6], %5 {strides = array<i32>} : memref<8x128xf32, #tpu.memory_space<vmem>>, vector<8x128xf32>,
    return
  }
  func.func @transform_0(%arg0: i32) -> (i32, i32) {
    %c0_i32 = arith.constant 0 : i32
    %c0_i32_0 = arith.constant 0 : i32
    return %arg0, %c0_i32 : i32, i32
  }
  func.func @transform_1(%arg0: i32) -> (i32, i32) {
    %c0_i32 = arith.constant 0 : i32
    %c0_i32_0 = arith.constant 0 : i32
    %c0_i32_1 = arith.constant 0 : i32
    return %c0_i32, %c0_i32_0 : i32, i32
  }
  func.func @transform_2(%arg0: i32) -> (i32, i32) {
    %c0_i32 = arith.constant 0 : i32
    %c0_i32_0 = arith.constant 0 : i32
    %c0_i32_1 = arith.constant 0 : i32
    return %c0_i32, %c0_i32_0 : i32, i32
  }
  func.func @transform_3(%arg0: i32) -> (i32, i32) {
    %c0_i32 = arith.constant 0 : i32
    %c0_i32_0 = arith.constant 0 : i32
    return %arg0, %c0_i32 : i32, i32
  }
}

</mosaic_0001>

<bundles_post_ra>
// kernel: tpu_custom_call.1
= control target key start
LH: loop header
LB: loop body
LE: loop exit
PB: predicated region body
PF: predicated region fallthrough
CT: control target
= control target key end

     0   :  { %8 = vsyncpa [#allocation3], 0  ;;  %s307_s0 = inlined_call_operand.hbm [shape: bf16[8,128], index: 0, kind: input, shape index: {}]   ;;  %s308_s1 = inlined_call_operand.hbm [shape: bf16[128,128], index: 1, kind: input, shape index: {}]   ;;  %s309_s2 = inlined_call_operand.vmem [shape: f32[1,128], index: 2, kind: input, shape index: {}]   ;;  %s310_s3 = inlined_call_operand.hbm [shape: f32[8,128], index: 3, kind: output, shape index: {}]  }
   0x1   :  { %9 = vsyncpa [#allocation6], 0 }
   0x2   :  { %10 = vsyncpa [#allocation4], 0  ;;  %s16_s14 = sshll.u32 %s307_s0, 4  ;;  %s270_s15 = smov [#allocation2]   ;;  %s17_s14 = int_to_ptr.hbm [resolvable:$true] %s16_s14 }
   0x3   :  { %s18_s16 = sshll.u32 %s270_s15, 4  ;;  %s26_s19 = sshll.u32 %s308_s1, 4  ;;  %s19_s16 = int_to_ptr.vmem [resolvable:$true] %s18_s16  ;;  %s27_s19 = int_to_ptr.hbm [resolvable:$true] %s26_s19 }
   0x4   :  { %21 = dma.hbm_to_vmem [thread:$0]  %s17_s14, 64, %s19_s16, [#allocation3]  }
   0x5   :  { %s271_s20 = smov [#allocation5]   ;;  %s272_s22 = smov 64  }
   0x6   :  { %s28_s21 = sshll.u32 %s271_s20, 4  ;;  %s273_s23 = smov 4   ;;  %s29_s21 = int_to_ptr.vmem [resolvable:$true] %s28_s21 }
   0x7   :  { %34 = dma.hbm_to_vmem [thread:$0]  %s27_s19, 1024, %s29_s21, [#allocation6], %s272_s22, %s272_s22, %s273_s23  }
   0x8   :  { %264 = dma.done.wait [#allocation3], 64  }
   0x9   :  { %265 = vsyncadd [#allocation3], 4294967232 }
   0xa   :  { %266 = dma.done.wait [#allocation6], 1024  }
   0xb   :  { %267 = vsyncadd [#allocation6], 4294966272  ;;  %v185_v0 = vld [vmem:[#allocation5 + $0x38] sm:$0xff]  ;;  %v184_v1 = vld [vmem:[#allocation5 + $0x30] sm:$0xff]  ;;  %s274_s24 = smov [#allocation7]   ;;  %s135_s28 = sshll.u32 %s310_s3, 4  ;;  %s136_s28 = int_to_ptr.hbm [resolvable:$true] %s135_s28 }
   0xc   :  { %114 = vmatpush.bf16.msra.mxu0 %v185_v0  ;;  %v183_v2 = vld [vmem:[#allocation5 + $0x28] sm:$0xff]  ;;  %v182_v3 = vld [vmem:[#allocation5 + $0x20] sm:$0xff]  ;;  %v181_v4 = vld [vmem:[#allocation5 + $0x18] sm:$0xff]  ;;  %s133_s25 = sshll.u32 %s274_s24, 4  ;;  %s134_s25 = int_to_ptr.vmem [resolvable:$true] %s133_s25 }
   0xd   :  { %v180_v5 = vld [vmem:[#allocation5 + $0x10] sm:$0xff]  ;;  %v179_v6 = vld [vmem:[#allocation5 + $0x8] sm:$0xff]  ;;  %v178_v7 = vld [vmem:[#allocation5] sm:$0xff] }
   0xe   :  { %v45_v8 = vld [vmem:[#allocation2] sm:$0xf] }
   0xf   :  { %v191_v9 = vld [vmem:[%s309_s2] ss:$0 sm:$0xff] }
  0x10   :  { %115 = vmatpush.bf16.msra.mxu0 %v184_v1 }
  0x14   :  { %116 = vmatpush.bf16.msra.mxu0 %v183_v2 }
  0x18   :  { %117 = vmatpush.bf16.msra.mxu0 %v182_v3 }
  0x1c   :  { %118 = vmatpush.bf16.msra.mxu0 %v181_v4 }
  0x20   :  { %119 = vmatpush.bf16.msra.mxu0 %v180_v5 }
  0x24   :  { %120 = vmatpush.bf16.msra.mxu0 %v179_v6 }
  0x28   :  { %121 = vmatpush.bf16.msra.mxu0 %v178_v7 }
  0x2b   :  { %122 = vmatmul.bf16.vlgmr.msra.gmra.mxu0 %v45_v8 }
  0xa8   :  { %v123_v10 = vpop.f32.mrf.mxu0 }
  0xa9   :  { %v124_v11 = vadd.f32 %v191_v9, %v123_v10 }
  0xab   :  { %127 = vst [vmem:[#allocation7] sm:$0xff] %v124_v11 }
  0xac   :  { %138 = dma.vmem_to_hbm [thread:$0]  %s134_s25, 128, %s136_s28, [#allocation4]  }
  0xb0   :  { %v125_v12 = vpop.f32.mrf.mxu0 }
  0xb1   :  { %268 = dma.done.wait [#allocation4], 128  }
  0xb2   :  { %269 = vsyncadd [#allocation4], 4294967168 }
  0xb3   :  { %143 = vsyncpa [#allocation3], 1 }
  0xb4   :  { %144 = vsyncpa [#allocation6], 1 }
  0xb5   :  { %145 = vsyncpa [#allocation4], 1 }

</bundles_post_ra>
